<compile_context>
chip_gen: v5e
topology: v5e:2x2
jax: 0.10.0
libtpu: 0.0.40
codegen_flags: <defaults>
</compile_context>

<pallas_src>
import math

import jax
import jax.numpy as jnp
from jax.experimental import pallas as pl
from jax.experimental.pallas import tpu as pltpu

D_MODEL = 128
MAX_LEN = 128

# Below this total size: single block, no grid.
_SINGLE_BLOCK_BYTES = 1 * 1024 * 1024
# Per x-block VMEM budget for the tiled path. Double-buffered x + out + pe
# ~= 4x this + 128 KiB, which fits v5e's 16 MiB default scoped VMEM and is
# already on the flat part of the tile-size vs HBM-BW curve.
_TILE_BLOCK_BYTES = 3 * 1024 * 1024


def make_positional_encoding(d_model: int, max_len: int) -> jnp.ndarray:
    """Deterministic sin/cos table, identical to the PyTorch __init__ buffer."""
    position = jnp.arange(max_len, dtype=jnp.float32)[:, None]            # (max_len, 1)
    div_term = jnp.exp(
        jnp.arange(0, d_model, 2, dtype=jnp.float32)
        * (-math.log(10000.0) / d_model)
    )                                                                     # (d_model//2,)
    angles = position * div_term                                          # (max_len, d_model//2)
    # interleave: pe[:, 0::2] = sin, pe[:, 1::2] = cos
    pe = jnp.stack([jnp.sin(angles), jnp.cos(angles)], axis=-1).reshape(max_len, d_model)
    return pe                                                             # (max_len, d_model)


def _pe_add_kernel(x_ref, pe_ref, o_ref):
    # x_ref: (TILE_B, TILE_S, D)  (or (B, S, D) on the no-grid path)
    # pe_ref: (TILE_S, D) — broadcasts over the leading batch dim.
    o_ref[...] = x_ref[...] + pe_ref[...]


def _packed_sublane(itemsize: int) -> int:
    # Sub-32-bit dtypes pack along sublanes: bf16 -> 16 rows/vreg, int8/fp8 -> 32.
    return {4: 8, 2: 16, 1: 32}.get(itemsize, 8)


def _choose_tiles(B: int, S: int, D: int, itemsize: int):
    """Pick (tile_b, tile_s) so one x block is <= _TILE_BLOCK_BYTES."""
    row_bytes = S * D * itemsize
    if row_bytes <= _TILE_BLOCK_BYTES:
        tile_b = max(1, min(B, _TILE_BLOCK_BYTES // row_bytes))
        if B >= 2:
            # Keep at least 2 grid steps so both TensorCores share the DMA on v7x.
            tile_b = min(tile_b, pl.cdiv(B, 2))
        return tile_b, S
    # A single (S, D) slice exceeds the budget: tile the sequence axis too.
    sub = _packed_sublane(itemsize)
    tile_s = max(sub, (_TILE_BLOCK_BYTES // (D * itemsize)) // sub * sub)
    tile_s = min(tile_s, S)
    return 1, tile_s


def positional_encoding_forward(x: jnp.ndarray, pe: jnp.ndarray,
                                *, force_grid: bool = False) -> jnp.ndarray:
    """x: (B, S, D); pe: (max_len, D). Returns x + pe[:S] (broadcast over B)."""
    B, S, D = x.shape
    max_len, pe_d = pe.shape
    if S > max_len:
        raise ValueError(f"seq_len {S} exceeds positional-encoding max_len {max_len}")
    if D != pe_d:
        raise ValueError(f"d_model mismatch: x has {D}, pe has {pe_d}")

    # TODO(synk): PyTorch adds the fp32 buffer and promotes (bf16 x -> fp32 out);
    # here pe is cast to x.dtype so the output dtype matches the input.
    pe_slice = pe[:S, :].astype(x.dtype)
    itemsize = jnp.dtype(x.dtype).itemsize
    x_bytes = B * S * D * itemsize

    if (not force_grid) and x_bytes <= _SINGLE_BLOCK_BYTES:
        # Tiny input: one block, no grid, no per-step pipeline overhead.
        # TODO(synk): for truly tiny inputs the real win is fusing this add into
        # the surrounding kernel (embedding / first attention block).
        return pl.pallas_call(
            _pe_add_kernel,
            out_shape=jax.ShapeDtypeStruct((B, S, D), x.dtype),
        )(x, pe_slice)

    tile_b, tile_s = _choose_tiles(B, S, D, itemsize)
    # Seq axis outer, batch axis inner: the pe block index is constant across
    # consecutive (inner) batch steps, so the resident pe tile is not re-DMA'd.
    grid = (pl.cdiv(S, tile_s), pl.cdiv(B, tile_b))

    return pl.pallas_call(
        _pe_add_kernel,
        out_shape=jax.ShapeDtypeStruct((B, S, D), x.dtype),
        grid_spec=pltpu.PrefetchScalarGridSpec(
            num_scalar_prefetch=0,
            grid=grid,
            in_specs=[
                pl.BlockSpec((tile_b, tile_s, D), lambda s, b: (b, s, 0)),
                pl.BlockSpec((tile_s, D), lambda s, b: (s, 0)),
            ],
            out_specs=pl.BlockSpec((tile_b, tile_s, D), lambda s, b: (b, s, 0)),
        ),
        compiler_params=pltpu.CompilerParams(
            dimension_semantics=("parallel", "parallel"),
        ),
    )(x, pe_slice)


if __name__ == "__main__":
    key = jax.random.PRNGKey(0)
    k1, k2 = jax.random.split(key)
    pe = make_positional_encoding(D_MODEL, MAX_LEN)

    # Path 1: toy shape -> single-block (no grid) path.
    B, S, D = 2, 8, D_MODEL
    x = jax.random.normal(k1, (B, S, D), dtype=jnp.float32)
    out = jax.block_until_ready(positional_encoding_forward(x, pe))
    ref = x + pe[None, :S, :]
    assert out.shape == (B, S, D)
    assert jnp.allclose(out, ref, atol=1e-6), "mismatch vs reference (no-grid path)"

    # Path 2: exercise the batch-tiled grid path (tile_b = ceil(B/2) -> 2 steps).
    B2, S2 = 4, MAX_LEN
    x2 = jax.random.normal(k2, (B2, S2, D), dtype=jnp.float32)
    out2 = jax.block_until_ready(positional_encoding_forward(x2, pe, force_grid=True))
    ref2 = x2 + pe[None, :S2, :]
    assert out2.shape == (B2, S2, D)
    assert jnp.allclose(out2, ref2, atol=1e-6), "mismatch vs reference (tiled path)"

    print("KERNEL_OK")
</pallas_src>

<mosaic_0001>
module attributes {stable_mosaic.version = 11 : i64} {
  func.func @_pe_add_kernel(%arg0: memref<2x8x128xf32, #tpu.memory_space<vmem>>, %arg1: memref<8x128xf32, #tpu.memory_space<vmem>>, %arg2: memref<2x8x128xf32, #tpu.memory_space<vmem>>) attributes {dimension_semantics = [], scalar_prefetch = 0 : i64, scratch_operands = 0 : i64, tpu.core_type = #tpu.core_type<tc>} {
    %c0 = arith.constant 0 : index
    %c0_0 = arith.constant 0 : index
    %c0_1 = arith.constant 0 : index
    %0 = vector.load %arg0[%c0, %c0_0, %c0_1] : memref<2x8x128xf32, #tpu.memory_space<vmem>>, vector<2x8x128xf32>
    %c0_2 = arith.constant 0 : index
    %c0_3 = arith.constant 0 : index
    %1 = vector.load %arg1[%c0_2, %c0_3] : memref<8x128xf32, #tpu.memory_space<vmem>>, vector<8x128xf32>
    %2 = vector.shape_cast %1 : vector<8x128xf32> to vector<1x8x128xf32>
    %3 = vector.broadcast %2 : vector<1x8x128xf32> to vector<2x8x128xf32>
    %4 = arith.addf %0, %3 : vector<2x8x128xf32>
    %c0_4 = arith.constant 0 : index
    %c0_5 = arith.constant 0 : index
    %c0_6 = arith.constant 0 : index
    %5 = vector.load %arg2[%c0_4, %c0_5, %c0_6] : memref<2x8x128xf32, #tpu.memory_space<vmem>>, vector<2x8x128xf32>
    tpu.vector_store %arg2[%c0_4, %c0_5, %c0_6], %4 {strides = array<i32>} : memref<2x8x128xf32, #tpu.memory_space<vmem>>, vector<2x8x128xf32>,
    return
  }
}

</mosaic_0001>

<bundles_post_ra>
// kernel: tpu_custom_call.1
= control target key start
LH: loop header
LB: loop body
LE: loop exit
PB: predicated region body
PF: predicated region fallthrough
CT: control target
= control target key end

     0   :  { %7 = vsyncpa [#allocation3], 0  ;;  %s181_s0 = inlined_call_operand.hbm [shape: f32[2,8,128], index: 0, kind: input, shape index: {}]   ;;  %s182_s1 = inlined_call_operand.hbm [shape: f32[8,128], index: 1, kind: input, shape index: {}]   ;;  %s183_s2 = inlined_call_operand.hbm [shape: f32[2,8,128], index: 2, kind: output, shape index: {}]  }
   0x1   :  { %8 = vsyncpa [#allocation6], 0 }
   0x2   :  { %9 = vsyncpa [#allocation4], 0  ;;  %s14_s11 = sshll.u32 %s181_s0, 4  ;;  %s152_s12 = smov [#allocation2]   ;;  %s15_s11 = int_to_ptr.hbm [resolvable:$true] %s14_s11 }
   0x3   :  { %s16_s13 = sshll.u32 %s152_s12, 4  ;;  %s28_s16 = sshll.u32 %s182_s1, 4  ;;  %s17_s13 = int_to_ptr.vmem [resolvable:$true] %s16_s13  ;;  %s29_s16 = int_to_ptr.hbm [resolvable:$true] %s28_s16 }
   0x4   :  { %s153_s17 = smov 128   ;;  %s154_s18 = smov 8  }
   0x5   :  { %22 = dma.hbm_to_vmem [thread:$0]  %s15_s11, 256, %s17_s13, [#allocation3], %s153_s17, %s153_s17, %s154_s18  }
   0x6   :  { %s155_s19 = smov [#allocation5]  }
   0x7   :  { %s30_s20 = sshll.u32 %s155_s19, 4  ;;  %s31_s20 = int_to_ptr.vmem [resolvable:$true] %s30_s20 }
   0x8   :  { %33 = dma.hbm_to_vmem [thread:$0]  %s29_s16, 128, %s31_s20, [#allocation6]  }
   0x9   :  { %146 = dma.done.wait [#allocation3], 256  }
   0xa   :  { %147 = vsyncadd [#allocation3], 4294967040 }
   0xb   :  { %148 = dma.done.wait [#allocation6], 128  }
   0xc   :  { %149 = vsyncadd [#allocation6], 4294967168  ;;  %s156_s0 = smov [#allocation7]   ;;  %s55_s24 = sshll.u32 %s183_s2, 4  ;;  %v42_v0 = vld [vmem:[#allocation2] sm:$0xff]  ;;  %v44_v1 = vld [vmem:[#allocation5] sm:$0xff]  ;;  %s56_s24 = int_to_ptr.hbm [resolvable:$true] %s55_s24 }
   0xd   :  { %s53_s21 = sshll.u32 %s156_s0, 4  ;;  %v43_v2 = vld [vmem:[#allocation2 + $0x8] sm:$0xff]  ;;  %v45_v3 = vadd.f32 %v44_v1, %v42_v0  ;;  %s54_s21 = int_to_ptr.vmem [resolvable:$true] %s53_s21 }
   0xe   :  { %v46_v4 = vadd.f32 %v44_v1, %v43_v2 }
   0xf   :  { %47 = vst [vmem:[#allocation7] sm:$0xff] %v45_v3 }
  0x10   :  { %48 = vst [vmem:[#allocation7 + $0x8] sm:$0xff] %v46_v4 }
  0x11   :  { %61 = dma.vmem_to_hbm [thread:$0]  %s54_s21, 256, %s56_s24, [#allocation4], %s153_s17, %s153_s17, %s154_s18  }
  0x12   :  { %150 = dma.done.wait [#allocation4], 256  }
  0x13   :  { %151 = vsyncadd [#allocation4], 4294967040 }
  0x14   :  { %66 = vsyncpa [#allocation3], 1 }
  0x15   :  { %67 = vsyncpa [#allocation6], 1 }
  0x16   :  { %68 = vsyncpa [#allocation4], 1 }

</bundles_post_ra>
